<compile_context>
chip_gen: v5e
topology: v5e:2x2
jax: 0.10.0
libtpu: 0.0.40
codegen_flags: <defaults>
</compile_context>

<pallas_src>
import jax
import jax.numpy as jnp
import numpy as np
from jax.experimental import pallas as pl
from jax.experimental.pallas import tpu as pltpu


def _message_attention_kernel(x_ref, pen_ref, w1bd_ref, w2blk_ref, expand_ref, y_ref):
    # x_ref:      (TB, MG, LW)  packed messages: lane p*He + j <-> (message mg*P + p, feature j)
    # pen_ref:    (TB, MG, P)   additive logit penalty (-500*(1-mask); -1e9 for padded msgs)
    # w1bd_ref:   (LW, LW)      block-diagonal W1^T (resident)
    # w2blk_ref:  (LW, P)       block-structured w2 column (resident)
    # expand_ref: (P, LW)       0/1 segment-expansion matrix (resident)
    # y_ref:      (TB, LW)      lane-dense per-segment partial outputs (wrapper sums P segments)
    TB, MG, LW = x_ref.shape
    P = pen_ref.shape[-1]
    R = TB * MG

    x = x_ref[...].astype(jnp.float32)      # bf16 transport upcasts here (f32 on v5e VPU)
    x2 = x.reshape(R, LW)                   # leading-dim flatten: layout-preserving

    # (1) h = tanh(x @ W1^T) as a dense 128-wide MXU tile (K = N = LW >= 128).
    h = jnp.tanh(jnp.dot(x2, w1bd_ref[...], preferred_element_type=jnp.float32))  # (R, LW)

    # (2) per-message attention scores, still in the packed-row layout.
    scores = jnp.dot(h, w2blk_ref[...], preferred_element_type=jnp.float32)       # (R, P)
    logits = scores.reshape(TB, MG, P) + pen_ref[...]                             # (TB, MG, P)

    # (3) masked softmax over all messages of each batch element (axes 1 and 2).
    #     Max-subtraction is required so all-masked rows stay finite like the reference.
    m = jnp.max(jnp.max(logits, axis=2, keepdims=True), axis=1, keepdims=True)    # (TB, 1, 1)
    e = jnp.exp(logits - m)                                                       # (TB, MG, P)
    s = jnp.sum(jnp.sum(e, axis=2, keepdims=True), axis=1, keepdims=True)         # (TB, 1, 1)
    u = e * (1.0 / s)                                                             # (TB, MG, P)

    # (4) expand u back onto the packed lane layout and reduce over messages.
    u_exp = jnp.dot(u.reshape(R, P), expand_ref[...],
                    preferred_element_type=jnp.float32)                           # (R, LW)
    y = jnp.sum(x * u_exp.reshape(TB, MG, LW), axis=1)                            # (TB, LW)
    y_ref[...] = y.astype(y_ref.dtype)


def message_attention(x, msg_mask, w1, w2, *, target_block_bytes=2 * 1024 * 1024):
    """x: (B, M, H), msg_mask: (B, M), w1: (H, H) torch (out,in), w2: (1, H) -> (B, H) f32.

    target_block_bytes ~ per-step x tile: ~1 MiB (v5e), 2 MiB (v6e), 4 MiB (v7x)."""
    B, M, H = x.shape
    assert w1.shape == (H, H) and w2.shape == (1, H) and msg_mask.shape == (B, M)

    # ---- lane-packing parameters --------------------------------------------------
    if H >= 128:
        He = ((H + 127) // 128) * 128      # no packing; pad H to a multiple of 128
        P = 1
    else:
        He = 1
        while He < H:                      # divisors of 128 are powers of two
            He *= 2
        P = 128 // He                      # messages packed per 128-lane row
    LW = P * He                            # packed lane width (multiple of 128)

    f32 = jnp.float32
    w1f = w1.astype(f32)
    w2f = w2.astype(f32)
    mask = msg_mask.astype(f32)

    # Pad the feature axis (zero features / zero weight rows+cols are inert).
    if He != H:
        x = jnp.pad(x, ((0, 0), (0, 0), (0, He - H)))
        w1f = jnp.pad(w1f, ((0, He - H), (0, He - H)))
        w2f = jnp.pad(w2f, ((0, 0), (0, He - H)))

    # Pad the message axis to a multiple of P*8 (pack factor x f32 sublanes).  Padded
    # messages get a -1e9 penalty so they never receive weight, even if every real
    # message is masked (strictly better than reusing the -500 mask penalty).
    m_blk = P * 8
    M_pad = ((M + m_blk - 1) // m_blk) * m_blk
    pen = -500.0 * (1.0 - mask)
    if M_pad != M:
        x = jnp.pad(x, ((0, 0), (0, M_pad - M), (0, 0)))
        pen = jnp.pad(pen, ((0, 0), (0, M_pad - M)), constant_values=-1e9)
    MG = M_pad // P

    # ---- batch tiling ---------------------------------------------------------------
    itemsize = jnp.dtype(x.dtype).itemsize
    x_row_bytes = MG * LW * itemsize                              # x bytes per batch element
    TB = max(8, (int(target_block_bytes // max(x_row_bytes, 1)) // 8) * 8)
    # Keep >= 2 grid steps when the batch allows it (megacore / 2-TC chips).
    TB = min(TB, max(8, 8 * ((B + 15) // 16)))

    # Keep the estimated VMEM footprint under budget (double-buffered blocks + temps).
    VMEM_BUDGET = 40 * 1024 * 1024
    def vmem_estimate(tb):
        x_blk = tb * MG * LW * itemsize
        pen_blk = tb * MG * 128 * 4        # P-wide minor is lane-padded to 128 in VMEM
        out_blk = tb * LW * 4
        w_bytes = (LW * LW + LW * 128 + 8 * LW) * 4
        temps = 4 * tb * MG * LW * 4       # x(f32), h, u_exp, x*u (compiler-managed)
        return 2 * (x_blk + pen_blk + out_blk) + 2 * w_bytes + temps
    while TB > 8 and vmem_estimate(TB) > VMEM_BUDGET:
        TB -= 8
    # TODO(synk): very long message axes (huge M even at TB=8) would need message-axis
    # tiling with an online softmax; not implemented here.

    B_pad = ((B + TB - 1) // TB) * TB
    if B_pad != B:
        x = jnp.pad(x, ((0, B_pad - B), (0, 0), (0, 0)))
        pen = jnp.pad(pen, ((0, B_pad - B), (0, 0)), constant_values=-1e9)

    # ---- packed operands (reshapes are layout-preserving; weights are tiny) ---------
    x_packed = x.reshape(B_pad, MG, LW)                    # lane = p*He + feature
    pen_packed = pen.reshape(B_pad, MG, P)
    eye = jnp.eye(P, dtype=f32)
    w1bd = jnp.kron(eye, w1f.T)                            # (LW, LW) block-diagonal W1^T
    w2blk = jnp.kron(eye, w2f.T)                           # (LW, P)
    expand = jnp.kron(eye, jnp.ones((1, He), f32))         # (P, LW)

    y = pl.pallas_call(
        _message_attention_kernel,
        out_shape=jax.ShapeDtypeStruct((B_pad, LW), jnp.float32),
        grid_spec=pltpu.PrefetchScalarGridSpec(
            num_scalar_prefetch=0,
            grid=(B_pad // TB,),
            in_specs=[
                pl.BlockSpec((TB, MG, LW), lambda b: (b, 0, 0)),   # packed x tile
                pl.BlockSpec((TB, MG, P), lambda b: (b, 0, 0)),    # additive penalties
                pl.BlockSpec((LW, LW), lambda b: (0, 0)),          # block-diag W1^T (resident)
                pl.BlockSpec((LW, P), lambda b: (0, 0)),           # block w2 (resident)
                pl.BlockSpec((P, LW), lambda b: (0, 0)),           # segment expansion (resident)
            ],
            out_specs=pl.BlockSpec((TB, LW), lambda b: (b, 0)),    # lane-dense partial slab
        ),
        compiler_params=pltpu.CompilerParams(
            dimension_semantics=("parallel",),
            vmem_limit_bytes=48 * 1024 * 1024),
    )(x_packed, pen_packed, w1bd, w2blk, expand)

    # Tiny P-way segment sum + un-padding, done by XLA outside the kernel.
    out = jnp.sum(y.reshape(B_pad, P, He), axis=1)
    return out[:B, :H]


def message_attention_reference(x, msg_mask, w1, w2):
    xf = x.astype(jnp.float32)
    att = jnp.tanh(jnp.einsum("bmh,oh->bmo", xf, w1))                 # (B, M, H)
    att = jnp.einsum("bmh,oh->bmo", att, w2)[..., 0]                  # (B, M)
    u = jax.nn.softmax(att - 500.0 * (1.0 - msg_mask), axis=1)        # (B, M)
    return jnp.sum(xf * u[..., None], axis=1)                         # (B, H)


if __name__ == "__main__":
    H = 32  # input_size = message hidden

    def make_case(key, B, M, x_dtype=jnp.float32):
        kx, km, kw1, kw2 = jax.random.split(key, 4)
        x = jax.random.normal(kx, (B, M, H), dtype=jnp.float32).astype(x_dtype)
        valid = jax.random.randint(km, (B,), 1, M + 1)
        msg_mask = (jnp.arange(M)[None, :] < valid[:, None]).astype(jnp.float32)
        bound = 1.0 / np.sqrt(H)
        w1 = jax.random.uniform(kw1, (H, H), jnp.float32, -bound, bound)  # Linear(H, H, bias=False)
        w2 = jax.random.uniform(kw2, (1, H), jnp.float32, -bound, bound)  # Linear(H, 1, bias=False)
        return x, msg_mask, w1, w2

    k1, k2, k3 = jax.random.split(jax.random.PRNGKey(0), 3)

    # Case 1: module-spec small shapes (single grid step, message padding 8 -> 32).
    x, msk, w1, w2 = make_case(k1, B=2, M=8)
    out = jax.block_until_ready(message_attention(x, msk, w1, w2))
    assert out.shape == (2, H)
    np.testing.assert_allclose(np.asarray(out),
                               np.asarray(message_attention_reference(x, msk, w1, w2)),
                               rtol=1e-4, atol=1e-4)

    # Case 2: multi-step grid + batch and message padding (B=40 -> TB=24, grid=(2,)).
    x, msk, w1, w2 = make_case(k2, B=40, M=50)
    out = jax.block_until_ready(message_attention(x, msk, w1, w2))
    assert out.shape == (40, H)
    np.testing.assert_allclose(np.asarray(out),
                               np.asarray(message_attention_reference(x, msk, w1, w2)),
                               rtol=1e-4, atol=1e-4)

    # Case 3: bf16 transport for x (f32 compute in-kernel); the reference uses the same
    # bf16-rounded x so the comparison isolates kernel arithmetic.
    x, msk, w1, w2 = make_case(k3, B=16, M=24, x_dtype=jnp.bfloat16)
    out = jax.block_until_ready(message_attention(x, msk, w1, w2))
    assert out.shape == (16, H)
    np.testing.assert_allclose(np.asarray(out),
                               np.asarray(message_attention_reference(x, msk, w1, w2)),
                               rtol=1e-4, atol=1e-4)

    print("KERNEL_OK")
</pallas_src>

<mosaic_0001>
module attributes {stable_mosaic.version = 11 : i64} {
  func.func @_message_attention_kernel(%arg0: i32, %arg1: memref<8x8x128xf32, #tpu.memory_space<vmem>>, %arg2: memref<8x8x4xf32, #tpu.memory_space<vmem>>, %arg3: memref<128x128xf32, #tpu.memory_space<vmem>>, %arg4: memref<128x4xf32, #tpu.memory_space<vmem>>, %arg5: memref<4x128xf32, #tpu.memory_space<vmem>>, %arg6: memref<8x128xf32, #tpu.memory_space<vmem>>) attributes {dimension_semantics = [#tpu.dimension_semantics<parallel>], iteration_bounds = array<i64: 1>, scalar_prefetch = 0 : i64, scratch_operands = 0 : i64, tpu.core_type = #tpu.core_type<tc>, window_params = [{transform_indices = @transform_0, window_bounds = array<i64: 8, 8, 128>}, {transform_indices = @transform_1, window_bounds = array<i64: 8, 8, 4>}, {pipeline_mode = #tpu.pipeline_mode<synchronous>, transform_indices = @transform_2, window_bounds = array<i64: 128, 128>}, {pipeline_mode = #tpu.pipeline_mode<synchronous>, transform_indices = @transform_3, window_bounds = array<i64: 128, 4>}, {pipeline_mode = #tpu.pipeline_mode<synchronous>, transform_indices = @transform_4, window_bounds = array<i64: 4, 128>}, {transform_indices = @transform_5, window_bounds = array<i64: 8, 128>}]} {
    %c0 = arith.constant 0 : index
    %c0_0 = arith.constant 0 : index
    %c0_1 = arith.constant 0 : index
    %0 = vector.load %arg1[%c0, %c0_0, %c0_1] : memref<8x8x128xf32, #tpu.memory_space<vmem>>, vector<8x8x128xf32>
    %1 = vector.shape_cast %0 : vector<8x8x128xf32> to vector<64x128xf32>
    %c0_2 = arith.constant 0 : index
    %c0_3 = arith.constant 0 : index
    %2 = vector.load %arg3[%c0_2, %c0_3] : memref<128x128xf32, #tpu.memory_space<vmem>>, vector<128x128xf32>
    %cst = arith.constant dense<0.000000e+00> : vector<64x128xf32>
    %3 = tpu.matmul %1, %2, %cst {dimension_numbers = #tpu.dot_dimension_numbers<[1], [0], [0], [1], [0, 0, 1, 1], [], []>} : vector<64x128xf32>, vector<128x128xf32>, vector<64x128xf32> -> vector<64x128xf32>
    %4 = math.tanh %3 : vector<64x128xf32>
    %c0_4 = arith.constant 0 : index
    %c0_5 = arith.constant 0 : index
    %5 = vector.load %arg4[%c0_4, %c0_5] : memref<128x4xf32, #tpu.memory_space<vmem>>, vector<128x4xf32>
    %cst_6 = arith.constant dense<0.000000e+00> : vector<64x4xf32>
    %6 = tpu.matmul %4, %5, %cst_6 {dimension_numbers = #tpu.dot_dimension_numbers<[1], [0], [0], [1], [0, 0, 1, 1], [], []>} : vector<64x128xf32>, vector<128x4xf32>, vector<64x4xf32> -> vector<64x4xf32>
    %7 = vector.shape_cast %6 : vector<64x4xf32> to vector<8x8x4xf32>
    %c0_7 = arith.constant 0 : index
    %c0_8 = arith.constant 0 : index
    %c0_9 = arith.constant 0 : index
    %8 = vector.load %arg2[%c0_7, %c0_8, %c0_9] : memref<8x8x4xf32, #tpu.memory_space<vmem>>, vector<8x8x4xf32>
    %9 = arith.addf %7, %8 : vector<8x8x4xf32>
    %cst_10 = arith.constant dense<0xFF800000> : vector<8x8xf32>
    %10 = vector.multi_reduction <maximumf>, %9, %cst_10 [2] : vector<8x8x4xf32> to vector<8x8xf32>
    %11 = vector.shape_cast %10 : vector<8x8xf32> to vector<8x8x1xf32>
    %cst_11 = arith.constant dense<0xFF800000> : vector<8x1xf32>
    %12 = vector.multi_reduction <maximumf>, %11, %cst_11 [1] : vector<8x8x1xf32> to vector<8x1xf32>
    %13 = vector.shape_cast %12 : vector<8x1xf32> to vector<8x1x1xf32>
    %14 = vector.broadcast %13 : vector<8x1x1xf32> to vector<8x8x4xf32>
    %15 = arith.subf %9, %14 : vector<8x8x4xf32>
    %16 = math.exp %15 : vector<8x8x4xf32>
    %cst_12 = arith.constant dense<0.000000e+00> : vector<8x8xf32>
    %17 = vector.multi_reduction <add>, %16, %cst_12 [2] : vector<8x8x4xf32> to vector<8x8xf32>
    %18 = vector.shape_cast %17 : vector<8x8xf32> to vector<8x8x1xf32>
    %cst_13 = arith.constant dense<0.000000e+00> : vector<8x1xf32>
    %19 = vector.multi_reduction <add>, %18, %cst_13 [1] : vector<8x8x1xf32> to vector<8x1xf32>
    %20 = vector.shape_cast %19 : vector<8x1xf32> to vector<8x1x1xf32>
    %cst_14 = arith.constant 1.000000e+00 : f32
    %21 = vector.broadcast %cst_14 : f32 to vector<8x1x1xf32>
    %22 = arith.divf %21, %20 : vector<8x1x1xf32>
    %23 = vector.broadcast %22 : vector<8x1x1xf32> to vector<8x8x4xf32>
    %24 = arith.mulf %16, %23 : vector<8x8x4xf32>
    %25 = vector.shape_cast %24 : vector<8x8x4xf32> to vector<64x4xf32>
    %c0_15 = arith.constant 0 : index
    %c0_16 = arith.constant 0 : index
    %26 = vector.load %arg5[%c0_15, %c0_16] : memref<4x128xf32, #tpu.memory_space<vmem>>, vector<4x128xf32>
    %cst_17 = arith.constant dense<0.000000e+00> : vector<64x128xf32>
    %27 = tpu.matmul %25, %26, %cst_17 {dimension_numbers = #tpu.dot_dimension_numbers<[1], [0], [0], [1], [0, 0, 1, 1], [], []>} : vector<64x4xf32>, vector<4x128xf32>, vector<64x128xf32> -> vector<64x128xf32>
    %28 = vector.shape_cast %27 : vector<64x128xf32> to vector<8x8x128xf32>
    %29 = arith.mulf %0, %28 : vector<8x8x128xf32>
    %cst_18 = arith.constant dense<0.000000e+00> : vector<8x128xf32>
    %30 = vector.multi_reduction <add>, %29, %cst_18 [1] : vector<8x8x128xf32> to vector<8x128xf32>
    %c0_19 = arith.constant 0 : index
    %c0_20 = arith.constant 0 : index
    %31 = vector.load %arg6[%c0_19, %c0_20] : memref<8x128xf32, #tpu.memory_space<vmem>>, vector<8x128xf32>
    tpu.vector_store %arg6[%c0_19, %c0_20], %30 {strides = array<i32>} : memref<8x128xf32, #tpu.memory_space<vmem>>, vector<8x128xf32>,
    return
  }
  func.func @transform_0(%arg0: i32) -> (i32, i32, i32) {
    %c0_i32 = arith.constant 0 : i32
    %c0_i32_0 = arith.constant 0 : i32
    %c0_i32_1 = arith.constant 0 : i32
    return %arg0, %c0_i32, %c0_i32_0 : i32, i32, i32
  }
  func.func @transform_1(%arg0: i32) -> (i32, i32, i32) {
    %c0_i32 = arith.constant 0 : i32
    %c0_i32_0 = arith.constant 0 : i32
    %c0_i32_1 = arith.constant 0 : i32
    return %arg0, %c0_i32, %c0_i32_0 : i32, i32, i32
  }
  func.func @transform_2(%arg0: i32) -> (i32, i32) {
    %c0_i32 = arith.constant 0 : i32
    %c0_i32_0 = arith.constant 0 : i32
    %c0_i32_1 = arith.constant 0 : i32
    return %c0_i32, %c0_i32_0 : i32, i32
  }
  func.func @transform_3(%arg0: i32) -> (i32, i32) {
    %c0_i32 = arith.constant 0 : i32
    %c0_i32_0 = arith.constant 0 : i32
    %c0_i32_1 = arith.constant 0 : i32
    return %c0_i32, %c0_i32_0 : i32, i32
  }
  func.func @transform_4(%arg0: i32) -> (i32, i32) {
    %c0_i32 = arith.constant 0 : i32
    %c0_i32_0 = arith.constant 0 : i32
    %c0_i32_1 = arith.constant 0 : i32
    return %c0_i32, %c0_i32_0 : i32, i32
  }
  func.func @transform_5(%arg0: i32) -> (i32, i32) {
    %c0_i32 = arith.constant 0 : i32
    %c0_i32_0 = arith.constant 0 : i32
    return %arg0, %c0_i32 : i32, i32
  }
}

</mosaic_0001>

<bundles_post_ra>
// kernel: tpu_custom_call.1
= control target key start
LH: loop header
LB: loop body
LE: loop exit
PB: predicated region body
PF: predicated region fallthrough
CT: control target
= control target key end

     0   :  { %s1061_s0 = inlined_call_operand.vmem [shape: f32[8,8,128], index: 0, kind: input, shape index: {}]   ;;  %s1062_s1 = inlined_call_operand.vmem [shape: f32[8,8,4], index: 1, kind: input, shape index: {}]   ;;  %s1063_s2 = inlined_call_operand.vmem [shape: f32[128,128], index: 2, kind: input, shape index: {}]   ;;  %s1064_s3 = inlined_call_operand.vmem [shape: f32[128,4], index: 3, kind: input, shape index: {}]   ;;  %s1065_s4 = inlined_call_operand.vmem [shape: f32[4,128], index: 4, kind: input, shape index: {}]   ;;  %s1066_s5 = inlined_call_operand.hbm [shape: f32[8,128], index: 5, kind: output, shape index: {}]  }
   0x1   :  { %v44_v0 = vld [vmem:[%s1063_s2 + $0x78] sm:$0xff]  ;;  %v43_v1 = vld [vmem:[%s1063_s2 + $0x70] sm:$0xff]  ;;  %v42_v2 = vld [vmem:[%s1063_s2 + $0x68] sm:$0xff] }
   0x2   :  { %45 = vmatpush.msra.mxu0 %v44_v0  ;;  %639 = vmatpush.msra.mxu3 %v44_v0  ;;  %v41_v3 = vld [vmem:[%s1063_s2 + $0x60] sm:$0xff]  ;;  %v40_v4 = vld [vmem:[%s1063_s2 + $0x58] sm:$0xff] }
   0x4   :  { %46 = vmatpush.msra.mxu0 %v43_v1  ;;  %640 = vmatpush.msra.mxu3 %v43_v1 }
   0x6   :  { %47 = vmatpush.msra.mxu0 %v42_v2  ;;  %641 = vmatpush.msra.mxu3 %v42_v2 }
   0x7   :  { %10 = vsyncpa [#allocation3], 0  ;;  %v39_v5 = vld [vmem:[%s1063_s2 + $0x50] sm:$0xff]  ;;  %v38_v6 = vld [vmem:[%s1063_s2 + $0x48] sm:$0xff]  ;;  %vm167_vm0 = vcmask 31744   ;;  %vm489_vm1 = vcmask 1043456  }
   0x8   :  { %48 = vmatpush.msra.mxu0 %v41_v3  ;;  %642 = vmatpush.msra.mxu3 %v41_v3  ;;  %v37_v7 = vld [vmem:[%s1063_s2 + $0x40] sm:$0xff]  ;;  %v36_v8 = vld [vmem:[%s1063_s2 + $0x38] sm:$0xff]  ;;  %v35_v9 = vld [vmem:[%s1063_s2 + $0x30] sm:$0xff]  ;;  %s621_s13 = sshll.u32 %s1066_s5, 4  ;;  %s622_s13 = int_to_ptr.hbm [resolvable:$true] %s621_s13 }
   0x9   :  { %v34_v10 = vld [vmem:[%s1063_s2 + $0x28] sm:$0xff]  ;;  %v33_v11 = vld [vmem:[%s1063_s2 + $0x20] sm:$0xff]  ;;  %v32_v12 = vld [vmem:[%s1063_s2 + $0x18] sm:$0xff] }
   0xa   :  { %49 = vmatpush.msra.mxu0 %v40_v4  ;;  %643 = vmatpush.msra.mxu3 %v40_v4  ;;  %v31_v13 = vld [vmem:[%s1063_s2 + $0x10] sm:$0xff]  ;;  %v30_v14 = vld [vmem:[%s1063_s2 + $0x8] sm:$0xff]  ;;  %v29_v15 = vld [vmem:[%s1063_s2] sm:$0xff] }
   0xb   :  { %v828_v16 = vld [vmem:[%s1061_s0] sm:$0xff]  ;;  %v833_v17 = vld [vmem:[%s1061_s0 + $0x28] sm:$0xff]  ;;  %v109_v18 = vld [vmem:[%s1064_s3 + $0x78] sm:$0xff] }
   0xc   :  { %50 = vmatpush.msra.mxu0 %v39_v5  ;;  %644 = vmatpush.msra.mxu3 %v39_v5  ;;  %v108_v19 = vld [vmem:[%s1064_s3 + $0x70] sm:$0xff]  ;;  %v107_v20 = vld [vmem:[%s1064_s3 + $0x68] sm:$0xff]  ;;  %v106_v21 = vld [vmem:[%s1064_s3 + $0x60] sm:$0xff] }
   0xd   :  { %110 = vmatpush.msra.mxu1 %v109_v18  ;;  %v852_v22 = vld [vmem:[%s1061_s0 + $0x8] sm:$0xff]  ;;  %v857_v23 = vld [vmem:[%s1061_s0 + $0x30] sm:$0xff]  ;;  %v105_v24 = vld [vmem:[%s1064_s3 + $0x58] sm:$0xff] }
   0xe   :  { %51 = vmatpush.msra.mxu0 %v38_v6  ;;  %645 = vmatpush.msra.mxu3 %v38_v6  ;;  %v104_v25 = vld [vmem:[%s1064_s3 + $0x50] sm:$0xff]  ;;  %v103_v26 = vld [vmem:[%s1064_s3 + $0x48] sm:$0xff]  ;;  %v102_v27 = vld [vmem:[%s1064_s3 + $0x40] sm:$0xff] }
   0xf   :  { %111 = vmatpush.msra.mxu1 %v108_v19  ;;  %v876_v28 = vld [vmem:[%s1061_s0 + $0x10] sm:$0xff]  ;;  %v881_v29 = vld [vmem:[%s1061_s0 + $0x38] sm:$0xff]  ;;  %v99_v32 = vld [vmem:[%s1064_s3 + $0x28] sm:$0xff] }
  0x10   :  { %52 = vmatpush.msra.mxu0 %v37_v7  ;;  %646 = vmatpush.msra.mxu3 %v37_v7  ;;  %v101_v30 = vld [vmem:[%s1064_s3 + $0x38] sm:$0xff]  ;;  %v100_v31 = vld [vmem:[%s1064_s3 + $0x30] sm:$0xff]  ;;  %v98_v33 = vld [vmem:[%s1064_s3 + $0x20] sm:$0xff] }
  0x11   :  { %112 = vmatpush.msra.mxu1 %v107_v20  ;;  %v900_v34 = vld [vmem:[%s1061_s0 + $0x18] sm:$0xff]  ;;  %v906_v35 = vld [vmem:[%s1061_s0 + $0x20] sm:$0xff]  ;;  %v96_v37 = vld [vmem:[%s1064_s3 + $0x10] sm:$0xff] }
  0x12   :  { %53 = vmatpush.msra.mxu0 %v36_v8  ;;  %647 = vmatpush.msra.mxu3 %v36_v8  ;;  %v97_v36 = vld [vmem:[%s1064_s3 + $0x18] sm:$0xff]  ;;  %v95_v38 = vld [vmem:[%s1064_s3 + $0x8] sm:$0xff]  ;;  %v94_v39 = vld [vmem:[%s1064_s3] sm:$0xff] }
  0x13   :  { %113 = vmatpush.msra.mxu1 %v106_v21  ;;  %v151_v56 = vld [vmem:[%s1062_s1] sm:$0xff]  ;;  %v152_v60 = vld [vmem:[%s1062_s1 + $0x8] sm:$0xff]  ;;  %v153_v0 = vld [vmem:[%s1062_s1 + $0x10] sm:$0xff] }
  0x14   :  { %54 = vmatpush.msra.mxu0 %v35_v9  ;;  %648 = vmatpush.msra.mxu3 %v35_v9  ;;  %v157_v3 = vld [vmem:[%s1062_s1 + $0x30] sm:$0xff]  ;;  %v154_v7 = vld [vmem:[%s1062_s1 + $0x18] sm:$0xff] }
  0x15   :  { %114 = vmatpush.msra.mxu1 %v105_v24 }
  0x16   :  { %55 = vmatpush.msra.mxu0 %v34_v10  ;;  %649 = vmatpush.msra.mxu3 %v34_v10 }
  0x17   :  { %115 = vmatpush.msra.mxu1 %v104_v25 }
  0x18   :  { %56 = vmatpush.msra.mxu0 %v33_v11  ;;  %650 = vmatpush.msra.mxu3 %v33_v11  ;;  %v158_v11 = vld [vmem:[%s1062_s1 + $0x38] sm:$0xff] }
  0x19   :  { %116 = vmatpush.msra.mxu1 %v103_v26 }
  0x1a   :  { %57 = vmatpush.msra.mxu0 %v32_v12  ;;  %651 = vmatpush.msra.mxu3 %v32_v12 }
  0x1b   :  { %117 = vmatpush.msra.mxu1 %v102_v27 }
  0x1c   :  { %58 = vmatpush.msra.mxu0 %v31_v13  ;;  %652 = vmatpush.msra.mxu3 %v31_v13 }
  0x1d   :  { %118 = vmatpush.msra.mxu1 %v101_v30 }
  0x1e   :  { %59 = vmatpush.msra.mxu0 %v30_v14  ;;  %653 = vmatpush.msra.mxu3 %v30_v14 }
  0x1f   :  { %119 = vmatpush.msra.mxu1 %v100_v31 }
  0x20   :  { %60 = vmatpush.msra.mxu0 %v29_v15  ;;  %654 = vmatpush.msra.mxu3 %v29_v15  ;;  %v155_v15 = vld [vmem:[%s1062_s1 + $0x20] sm:$0xff] }
  0x21   :  { %61 = vmatmul.f32.vlgmr.msra.gmra.mxu0 %v828_v16  ;;  %76 = vmatmul.f32.vlgmr.msra.gmra.mxu3 %v833_v17 }
  0x22   :  { %655 = vmatpush.msrb.mxu3 %v109_v18  ;;  %120 = vmatpush.msra.mxu1 %v99_v32 }
  0x24   :  { %656 = vmatpush.msrb.mxu3 %v108_v19  ;;  %121 = vmatpush.msra.mxu1 %v98_v33 }
  0x26   :  { %657 = vmatpush.msrb.mxu3 %v107_v20  ;;  %122 = vmatpush.msra.mxu1 %v97_v36 }
  0x28   :  { %658 = vmatpush.msrb.mxu3 %v106_v21  ;;  %123 = vmatpush.msra.mxu1 %v96_v37 }
  0x29   :  { %64 = vmatmul.f32.gmra.mxu0 %v852_v22  ;;  %79 = vmatmul.f32.gmra.mxu3 %v857_v23 }
  0x2a   :  { %659 = vmatpush.msrb.mxu3 %v105_v24  ;;  %124 = vmatpush.msra.mxu1 %v95_v38  ;;  %v156_v24 = vld [vmem:[%s1062_s1 + $0x28] sm:$0xff] }
  0x2c   :  { %660 = vmatpush.msrb.mxu3 %v104_v25  ;;  %125 = vmatpush.msra.mxu1 %v94_v39 }
  0x2e   :  { %661 = vmatpush.msrb.mxu3 %v103_v26 }
  0x30   :  { %662 = vmatpush.msrb.mxu3 %v102_v27 }
  0x31   :  { %67 = vmatmul.f32.gmra.mxu0 %v876_v28  ;;  %82 = vmatmul.f32.gmra.mxu3 %v881_v29 }
  0x32   :  { %663 = vmatpush.msrb.mxu3 %v101_v30 }
  0x34   :  { %664 = vmatpush.msrb.mxu3 %v100_v31 }
  0x36   :  { %665 = vmatpush.msrb.mxu3 %v99_v32 }
  0x38   :  { %666 = vmatpush.msrb.mxu3 %v98_v33 }
  0x39   :  { %70 = vmatmul.f32.gmra.mxu0 %v900_v34 }
  0x3a   :  { %667 = vmatpush.msrb.mxu3 %v97_v36 }
  0x3c   :  { %668 = vmatpush.msrb.mxu3 %v96_v37 }
  0x3e   :  { %669 = vmatpush.msrb.mxu3 %v95_v38 }
  0x40   :  { %670 = vmatpush.msrb.mxu3 %v94_v39 }
  0x41   :  { %73 = vmatmul.f32.gmra.mxu0 %v906_v35 }
  0x9e   :  { %v62_v40 = vpop.f32.mrf.mxu0 }
  0x9f   :  { %672 = vtanh.f32 %v62_v40 }
  0xa4   :  { %v77_v41 = vpop.f32.mrf.mxu3 }
  0xa5   :  { %v673_v42 = vpop.eup %672 }
  0xa6   :  { %v65_v43 = vpop.f32.mrf.mxu0  ;;  %126 = vmatmul.f32.vlgmr.msra.gmra.mxu1 %v673_v42 }
  0xa7   :  { %674 = vtanh.f32 %v65_v43 }
  0xac   :  { %v80_v44 = vpop.f32.mrf.mxu3 }
  0xad   :  { %v675_v45 = vpop.eup %674  ;;  %676 = vtanh.f32 %v80_v44 }
  0xae   :  { %v68_v46 = vpop.f32.mrf.mxu0  ;;  %129 = vmatmul.f32.gmra.mxu1 %v675_v45 }
  0xaf   :  { %678 = vtanh.f32 %v68_v46 }
  0xb3   :  { %v677_v47 = vpop.eup %676 }
  0xb4   :  { %144 = vmatmul.f32.vlgmr.msrb.gmra.mxu3 %v677_v47  ;;  %v83_v48 = vpop.f32.mrf.mxu3 }
  0xb5   :  { %v679_v49 = vpop.eup %678  ;;  %680 = vtanh.f32 %v83_v48 }
  0xb6   :  { %v71_v50 = vpop.f32.mrf.mxu0  ;;  %132 = vmatmul.f32.gmra.mxu1 %v679_v49 }
  0xb7   :  { %682 = vtanh.f32 %v71_v50 }
  0xbb   :  { %v681_v51 = vpop.eup %680 }
  0xbc   :  { %147 = vmatmul.f32.gmra.mxu3 %v681_v51 }
  0xbd   :  { %v683_v52 = vpop.eup %682 }
  0xbe   :  { %v74_v53 = vpop.f32.mrf.mxu0  ;;  %135 = vmatmul.f32.gmra.mxu1 %v683_v52 }
  0xbf   :  { %684 = vtanh.f32 %v74_v53 }
  0xc0   :  { %686 = vtanh.f32 %v77_v41 }
  0xc5   :  { %v685_v54 = vpop.eup %684 }
  0xc6   :  { %138 = vmatmul.f32.gmra.mxu1 %v685_v54  ;;  %v687_v55 = vpop.eup %686 }
  0xce   :  { %141 = vmatmul.f32.gmra.mxu1 %v687_v55 }
 0x123   :  { %v127_v57 = vpop.f32.mrf.mxu1 }
 0x124   :  { %v159_v58 = vadd.f32 %v151_v56, %v127_v57 }
 0x126   :  { %v168_v59 = vsel %vm167_vm0, %v159_v58, -inf }
 0x127   :  { %169 = vmax.xlane.f32.xlu0 %v168_v59 }
 0x12b   :  { %v130_v61 = vpop.f32.mrf.mxu1 }
 0x12c   :  { %v160_v62 = vadd.f32 %v152_v60, %v130_v61 }
 0x12e   :  { %v171_v63 = vsel %vm167_vm0, %v160_v62, -inf }
 0x12f   :  { %172 = vmax.xlane.f32.xlu0 %v171_v63 }
 0x133   :  { %v133_v1 = vpop.f32.mrf.mxu1 }
 0x134   :  { %v932_v2 = vadd.f32 %v153_v0, %v133_v1 }
 0x136   :  { %v174_v4 = vsel %vm167_vm0, %v932_v2, -inf }
 0x137   :  { %v145_v5 = vpop.f32.mrf.mxu3  ;;  %175 = vmax.xlane.f32.xlu1 %v174_v4 }
 0x138   :  { %v939_v6 = vadd.f32 %v157_v3, %v145_v5 }
 0x13a   :  { %v186_v8 = vsel %vm167_vm0, %v939_v6, -inf }
 0x13b   :  { %187 = vmax.xlane.f32.xlu0 %v186_v8  ;;  %v136_v9 = vpop.f32.mrf.mxu1 }
 0x13c   :  { %v946_v10 = vadd.f32 %v154_v7, %v136_v9 }
 0x13e   :  { %v177_v12 = vsel %vm167_vm0, %v946_v10, -inf }
 0x13f   :  { %178 = vmax.xlane.f32.xlu1 %v177_v12  ;;  %v148_v13 = vpop.f32.mrf.mxu3 }
 0x140   :  { %v953_v14 = vadd.f32 %v158_v11, %v148_v13 }
 0x142   :  { %v189_v20 = vsel %vm167_vm0, %v953_v14, -inf }
 0x143   :  { %v139_v18 = vpop.f32.mrf.mxu1 }
 0x144   :  { %v958_v19 = vadd.f32 %v155_v15, %v139_v18 }
 0x146   :  { %v180_v21 = vsel %vm167_vm0, %v958_v19, -inf }
 0x147   :  { %190 = vmax.xlane.f32.xlu1 %v189_v20  ;;  %181 = vmax.xlane.f32.xlu2 %v180_v21 }
 0x14b   :  { %v142_v25 = vpop.f32.mrf.mxu1 }
 0x14c   :  { %v967_v26 = vadd.f32 %v156_v24, %v142_v25 }
 0x14e   :  { %v183_v27 = vsel %vm167_vm0, %v967_v26, -inf }
 0x14f   :  { %184 = vmax.xlane.f32.xlu2 %v183_v27 }
 0x19a   :  { %v170_v30 = vpop.xlane.xlu0 %169 }
 0x19b   :  { %v192_v31 = vrot.slane %v170_v30, 4 }
 0x19d   :  { %v193_v32 = vmax.f32 %v170_v30, %v192_v31 }
 0x19f   :  { %v194_v33 = vrot.slane %v193_v32, 2 }
 0x1a1   :  { %v195_v36 = vmax.f32 %v193_v32, %v194_v33 }
 0x1a2   :  { %v173_v37 = vpop.xlane.xlu0 %172 }
 0x1a3   :  { %v196_v38 = vrot.slane %v195_v36, 1  ;;  %v198_v39 = vrot.slane %v173_v37, 4 }
 0x1a5   :  { %v197_v40 = vmax.f32 %v195_v36, %v196_v38  ;;  %v199_v41 = vmax.f32 %v173_v37, %v198_v39 }
 0x1a7   :  { %v240_v42 = vsub.f32 %v159_v58, %v197_v40  ;;  %v200_v43 = vrot.slane %v199_v41, 2 }
 0x1a9   :  { %v201_v44 = vmax.f32 %v199_v41, %v200_v43  ;;  %v248_v45 = vmul.f32 1.442695, %v240_v42 }
 0x1aa   :  { %v176_v46 = vpop.xlane.xlu1 %175 }
 0x1ab   :  { %v202_v47 = vrot.slane %v201_v44, 1  ;;  %v204_v48 = vrot.slane %v176_v46, 4  ;;  %688 = vpow2.f32 %v248_v45 }
 0x1ad   :  { %v203_v49 = vmax.f32 %v201_v44, %v202_v47  ;;  %v205_v50 = vmax.f32 %v176_v46, %v204_v48 }
 0x1ae   :  { %v188_v51 = vpop.xlane.xlu0 %187 }
 0x1af   :  { %v241_v52 = vsub.f32 %v160_v62, %v203_v49  ;;  %v206_v53 = vrot.slane %v205_v50, 2  ;;  %v228_v54 = vrot.slane %v188_v51, 4 }
 0x1b1   :  { %v971_v55 = vpop.eup %688  ;;  %v207_v56 = vmax.f32 %v205_v50, %v206_v53  ;;  %v229_v57 = vmax.f32 %v188_v51, %v228_v54  ;;  %v250_v59 = vmul.f32 1.442695, %v241_v52 }
 0x1b2   :  { %v179_v60 = vpop.xlane.xlu1 %178  ;;  %v264_v58 = vsel %vm167_vm0, %v971_v55, 0.0 }
 0x1b3   :  { %v208_v61 = vrot.slane %v207_v56, 1  ;;  %v230_v63 = vrot.slane %v229_v57, 2  ;;  %v210_v0 = vrot.slane %v179_v60, 4  ;;  %265 = vadd.xlane.f32.xlu2 %v264_v58  ;;  %690 = vpow2.f32 %v250_v59 }
 0x1b5   :  { %v209_v1 = vmax.f32 %v207_v56, %v208_v61  ;;  %v211_v3 = vmax.f32 %v179_v60, %v210_v0  ;;  %v231_v4 = vmax.f32 %v229_v57, %v230_v63 }
 0x1b7   :  { %v242_v62 = vsub.f32 %v932_v2, %v209_v1  ;;  %v212_v5 = vrot.slane %v211_v3, 2  ;;  %v232_v11 = vrot.slane %v231_v4, 1 }
 0x1b9   :  { %v976_v7 = vpop.eup %690  ;;  %v213_v8 = vmax.f32 %v211_v3, %v212_v5  ;;  %v252_v9 = vmul.f32 1.442695, %v242_v62  ;;  %v233_v2 = vmax.f32 %v231_v4, %v232_v11  ;;  %v464_v3 = vld [vmem:[%s1065_s4] sm:$0xf]  ;;  %s746_s4 = smov [#allocation2]  }
 0x1ba   :  { %v191_v12 = vpop.xlane.xlu1 %190  ;;  %v182_v13 = vpop.xlane.xlu2 %181  ;;  %v267_v15 = vsel %vm167_vm0, %v976_v7, 0.0  ;;  %630 = vmatpush.msk.msra.mxu2 %vm489_vm1, %v464_v3  ;;  %s619_s10 = sshll.u32 %s746_s4, 4  ;;  %s620_s10 = int_to_ptr.vmem [resolvable:$true] %s619_s10 }
 0x1bb   :  { %v214_v18 = vrot.slane %v213_v8, 1  ;;  %v234_v20 = vrot.slane %v191_v12, 4  ;;  %v216_v21 = vrot.slane %v182_v13, 4  ;;  %268 = vadd.xlane.f32.xlu0 %v267_v15  ;;  %692 = vpow2.f32 %v252_v9 }
 0x1bc   :  { %v246_v39 = vsub.f32 %v939_v6, %v233_v2 }
 0x1bd   :  { %v215_v24 = vmax.f32 %v213_v8, %v214_v18  ;;  %v235_v25 = vmax.f32 %v191_v12, %v234_v20  ;;  %v217_v27 = vmax.f32 %v182_v13, %v216_v21 }
 0x1be   :  { %v260_v47 = vmul.f32 1.442695, %v246_v39 }
 0x1bf   :  { %v243_v30 = vsub.f32 %v946_v10, %v215_v24  ;;  %v236_v31 = vrot.slane %v235_v25, 2  ;;  %v218_v32 = vrot.slane %v217_v27, 2 }
 0x1c1   :  { %v237_v33 = vmax.f32 %v235_v25, %v236_v31  ;;  %v219_v36 = vmax.f32 %v217_v27, %v218_v32  ;;  %v254_v37 = vmul.f32 1.442695, %v243_v30  ;;  %v981_v38 = vpop.eup %692 }
 0x1c2   :  { %v185_v40 = vpop.xlane.xlu2 %184  ;;  %v270_v44 = vsel %vm167_vm0, %v981_v38, 0.0 }
 0x1c3   :  { %v238_v41 = vrot.slane %v237_v33, 1  ;;  %v220_v42 = vrot.slane %v219_v36, 1  ;;  %v222_v43 = vrot.slane %v185_v40, 4  ;;  %271 = vadd.xlane.f32.xlu1 %v270_v44  ;;  %694 = vpow2.f32 %v254_v37 }
 0x1c4   :  { %696 = vpow2.f32 %v260_v47 }
 0x1c5   :  { %v239_v45 = vmax.f32 %v237_v33, %v238_v41  ;;  %v221_v10 = vmax.f32 %v219_v36, %v220_v42  ;;  %v223_v46 = vmax.f32 %v185_v40, %v222_v43 }
 0x1c7   :  { %v244_v48 = vsub.f32 %v958_v19, %v221_v10  ;;  %v224_v49 = vrot.slane %v223_v46, 2  ;;  %v247_v50 = vsub.f32 %v953_v14, %v239_v45 }
 0x1c9   :  { %v225_v51 = vmax.f32 %v223_v46, %v224_v49  ;;  %v256_v6 = vmul.f32 1.442695, %v244_v48  ;;  %v988_v52 = vpop.eup %694  ;;  %v262_v57 = vmul.f32 1.442695, %v247_v50 }
 0x1ca   :  { %v273_v54 = vsel %vm167_vm0, %v988_v52, 0.0  ;;  %v993_v60 = vpop.eup %696 }
 0x1cb   :  { %v226_v53 = vrot.slane %v225_v51, 1  ;;  %698 = vpow2.f32 %v256_v6  ;;  %274 = vadd.xlane.f32.xlu2 %v273_v54  ;;  %v282_v61 = vsel %vm167_vm0, %v993_v60, 0.0 }
 0x1cc   :  { %700 = vpow2.f32 %v262_v57 }
 0x1cd   :  { %v227_v56 = vmax.f32 %v225_v51, %v226_v53 }
 0x1cf   :  { %v245_v59 = vsub.f32 %v967_v26, %v227_v56 }
 0x1d1   :  { %v995_v19 = vpop.eup %698  ;;  %v258_v14 = vmul.f32 1.442695, %v245_v59 }
 0x1d2   :  { %v276_v58 = vsel %vm167_vm0, %v995_v19, 0.0  ;;  %v1001_v63 = vpop.eup %700 }
 0x1d3   :  { %277 = vadd.xlane.f32.xlu0 %v276_v58  ;;  %702 = vpow2.f32 %v258_v14  ;;  %283 = vadd.xlane.f32.xlu2 %v282_v61  ;;  %v285_v26 = vsel %vm167_vm0, %v1001_v63, 0.0 }
 0x1d9   :  { %v1003_v0 = vpop.eup %702 }
 0x1da   :  { %v279_v1 = vsel %vm167_vm0, %v1003_v0, 0.0 }
 0x1db   :  { %286 = vadd.xlane.f32.xlu0 %v285_v26  ;;  %280 = vadd.xlane.f32.xlu1 %v279_v1 }
 0x226   :  { %v266_v4 = vpop.xlane.xlu2 %265 }
 0x227   :  { %v288_v62 = vrot.slane %v266_v4, 4 }
 0x229   :  { %v289_v5 = vadd.f32 %v288_v62, %v266_v4 }
 0x22b   :  { %v290_v8 = vrot.slane %v289_v5, 2 }
 0x22d   :  { %v291_v9 = vadd.f32 %v290_v8, %v289_v5 }
 0x22e   :  { %v269_v11 = vpop.xlane.xlu0 %268 }
 0x22f   :  { %v292_v12 = vrot.slane %v291_v9, 1  ;;  %v294_v13 = vrot.slane %v269_v11, 4 }
 0x231   :  { %v293_v15 = vadd.f32 %v292_v12, %v291_v9  ;;  %v295_v18 = vadd.f32 %v294_v13, %v269_v11 }
 0x233   :  { %704 = vrcp.f32 %v293_v15  ;;  %v296_v20 = vrot.slane %v295_v18, 2  ;;  %v345_v37 = vand.u32 2147483647, %v293_v15  ;;  %v347_v39 = vand.u32 2147483648, %v293_v15 }
 0x234   :  { %vm341_vm3 = vweird.f32 %v293_v15 }
 0x235   :  { %v297_v21 = vadd.f32 %v296_v20, %v295_v18  ;;  %vm346_vm5 = vcmp.eq.f32.partialorder %v345_v37, 8.507059e+37  ;;  %v348_v46 = vor.u32 1.1754944e-38, %v347_v39 }
 0x236   :  { %v272_v25 = vpop.xlane.xlu1 %271 }
 0x237   :  { %v298_v24 = vrot.slane %v297_v21, 1  ;;  %v300_v27 = vrot.slane %v272_v25, 4 }
 0x239   :  { %v705_v2 = vpop.eup %704  ;;  %v299_v30 = vadd.f32 %v298_v24, %v297_v21  ;;  %v301_v31 = vadd.f32 %v300_v27, %v272_v25 }
 0x23a   :  { %v337_v32 = vmul.f32 %v705_v2, %v293_v15  ;;  %vm342_vm2 = vweird.f32 %v705_v2 }
 0x23b   :  { %706 = vrcp.f32 %v299_v30  ;;  %v302_v33 = vrot.slane %v301_v31, 2  ;;  %vm343_vm4 = vmor %vm341_vm3, %vm342_vm2  ;;  %v362_v56 = vand.u32 2147483648, %v299_v30  ;;  %v360_v58 = vand.u32 2147483647, %v299_v30 }
 0x23c   :  { %v338_v36 = vsub.f32 1.0, %v337_v32  ;;  %vm356_vm7 = vweird.f32 %v299_v30 }
 0x23d   :  { %v303_v40 = vadd.f32 %v302_v33, %v301_v31  ;;  %v363_v5 = vor.u32 1.1754944e-38, %v362_v56  ;;  %vm361_vm9 = vcmp.eq.f32.partialorder %v360_v58, 8.507059e+37 }
 0x23e   :  { %v339_v41 = vmul.f32 %v705_v2, %v338_v36  ;;  %v275_v42 = vpop.xlane.xlu2 %274 }
 0x23f   :  { %v304_v43 = vrot.slane %v303_v40, 1  ;;  %v306_v44 = vrot.slane %v275_v42, 4 }
 0x240   :  { %v340_v45 = vadd.f32 %v705_v2, %v339_v41 }
 0x241   :  { %v707_v10 = vpop.eup %706  ;;  %v305_v47 = vadd.f32 %v304_v43, %v303_v40  ;;  %v307_v48 = vadd.f32 %v306_v44, %v275_v42 }
 0x242   :  { %v344_v49 = vsel %vm343_vm4, %v705_v2, %v340_v45  ;;  %v352_v50 = vmul.f32 %v707_v10, %v299_v30  ;;  %vm357_vm6 = vweird.f32 %v707_v10 }
 0x243   :  { %v349_v51 = vsel %vm346_vm5, %v348_v46, %v344_v49  ;;  %708 = vrcp.f32 %v305_v47  ;;  %v308_v6 = vrot.slane %v307_v48, 2  ;;  %vm358_vm8 = vmor %vm356_vm7, %vm357_vm6  ;;  %v375_v30 = vand.u32 2147483647, %v305_v47 }
 0x244   :  { %v456_v53 = vmul.f32 %v971_v55, %v349_v51  ;;  %v353_v54 = vsub.f32 1.0, %v352_v50  ;;  %v377_v31 = vand.u32 2147483648, %v305_v47  ;;  %vm371_vm11 = vweird.f32 %v305_v47 }
 0x245   :  { %v309_v57 = vadd.f32 %v308_v6, %v307_v48  ;;  %vm376_vm13 = vcmp.eq.f32.partialorder %v375_v30, 8.507059e+37 }
 0x246   :  { %v278_v59 = vpop.xlane.xlu0 %277  ;;  %631 = vmatmul.msk.f32.vlgmr.msra.gmra.mxu2 %vm167_vm0, %v456_v53  ;;  %v354_v14 = vmul.f32 %v707_v10, %v353_v54  ;;  %v284_v26 = vpop.xlane.xlu2 %283  ;;  %v378_v45 = vor.u32 1.1754944e-38, %v377_v31 }
 0x247   :  { %v312_v61 = vrot.slane %v278_v59, 4  ;;  %v310_v1 = vrot.slane %v309_v57, 1  ;;  %v324_v3 = vrot.slane %v284_v26, 4 }
 0x248   :  { %v355_v4 = vadd.f32 %v707_v10, %v354_v14 }
 0x249   :  { %v313_v62 = vadd.f32 %v312_v61, %v278_v59  ;;  %v709_v8 = vpop.eup %708  ;;  %v1014_v55 = vadd.f32 %v310_v1, %v309_v57  ;;  %v325_v9 = vadd.f32 %v324_v3, %v284_v26 }
 0x24a   :  { %v359_v11 = vsel %vm358_vm8, %v707_v10, %v355_v4  ;;  %v367_v15 = vmul.f32 %v709_v8, %v305_v47  ;;  %vm372_vm10 = vweird.f32 %v709_v8 }
 0x24b   :  { %v314_v12 = vrot.slane %v313_v62, 2  ;;  %v364_v13 = vsel %vm361_vm9, %v363_v5, %v359_v11  ;;  %710 = vrcp.f32 %v1014_v55  ;;  %v326_v18 = vrot.slane %v325_v9, 2  ;;  %vm373_vm12 = vmor %vm371_vm11, %vm372_vm10 }
 0x24c   :  { %v457_v20 = vmul.f32 %v976_v7, %v364_v13  ;;  %v368_v24 = vsub.f32 1.0, %v367_v15  ;;  %v392_v57 = vand.u32 2147483648, %v1014_v55  ;;  %v390_v14 = vand.u32 2147483647, %v1014_v55 }
 0x24d   :  { %v315_v21 = vadd.f32 %v314_v12, %v313_v62  ;;  %v327_v25 = vadd.f32 %v326_v18, %v325_v9  ;;  %vm386_vm15 = vweird.f32 %v1014_v55 }
 0x24e   :  { %v287_v27 = vpop.xlane.xlu0 %286  ;;  %v281_v2 = vpop.xlane.xlu1 %280  ;;  %632 = vmatmul.msk.f32.gmra.mxu2 %vm167_vm0, %v457_v20  ;;  %v369_v37 = vmul.f32 %v709_v8, %v368_v24  ;;  %v393_v3 = vor.u32 1.1754944e-38, %v392_v57  ;;  %vm391_vm2 = vcmp.eq.f32.partialorder %v390_v14, 8.507059e+37 }
 0x24f   :  { %v316_v32 = vrot.slane %v315_v21, 1  ;;  %v330_v33 = vrot.slane %v287_v27, 4  ;;  %v318_v36 = vrot.slane %v281_v2, 4  ;;  %v328_v39 = vrot.slane %v327_v25, 1 }
 0x250   :  { %v370_v7 = vadd.f32 %v709_v8, %v369_v37 }
 0x251   :  { %v317_v40 = vadd.f32 %v316_v32, %v315_v21  ;;  %v331_v41 = vadd.f32 %v330_v33, %v287_v27  ;;  %v319_v42 = vadd.f32 %v318_v36, %v281_v2  ;;  %v711_v43 = vpop.eup %710  ;;  %v1019_v44 = vadd.f32 %v328_v39, %v327_v25 }
 0x252   :  { %v374_v48 = vsel %vm373_vm12, %v709_v8, %v370_v7  ;;  %v382_v50 = vmul.f32 %v711_v43, %v1014_v55  ;;  %vm387_vm14 = vweird.f32 %v711_v43 }
 0x253   :  { %712 = vrcp.f32 %v317_v40  ;;  %v332_v10 = vrot.slane %v331_v41, 2  ;;  %v320_v46 = vrot.slane %v319_v42, 2  ;;  %v379_v49 = vsel %vm376_vm13, %v378_v45, %v374_v48  ;;  %vm388_vm1 = vmor %vm386_vm15, %vm387_vm14 }
 0x254   :  { %v458_v6 = vmul.f32 %v981_v38, %v379_v49  ;;  %v383_v53 = vsub.f32 1.0, %v382_v50  ;;  %714 = vrcp.f32 %v1019_v44  ;;  %v407_v9 = vand.u32 2147483648, %v317_v40 }
 0x255   :  { %v333_v51 = vadd.f32 %v332_v10, %v331_v41  ;;  %v321_v47 = vadd.f32 %v320_v46, %v319_v42  ;;  %v405_v13 = vand.u32 2147483647, %v317_v40  ;;  %vm401_vm4 = vweird.f32 %v317_v40 }
 0x256   :  { %633 = vmatmul.msk.f32.gmra.mxu2 %vm167_vm0, %v458_v6  ;;  %v384_v59 = vmul.f32 %v711_v43, %v383_v53  ;;  %v408_v18 = vor.u32 1.1754944e-38, %v407_v9  ;;  %v437_v45 = vand.u32 2147483648, %v1019_v44  ;;  %vm431_vm12 = vweird.f32 %v1019_v44 }
 0x257   :  { %v334_v54 = vrot.slane %v333_v51, 1  ;;  %v322_v56 = vrot.slane %v321_v47, 1  ;;  %vm406_vm6 = vcmp.eq.f32.partialorder %v405_v13, 8.507059e+37  ;;  %v435_v10 = vand.u32 2147483647, %v1019_v44 }
 0x258   :  { %v385_v26 = vadd.f32 %v711_v43, %v384_v59  ;;  %v438_v49 = vor.u32 1.1754944e-38, %v437_v45 }
 0x259   :  { %v713_v58 = vpop.eup %712  ;;  %v323_v61 = vadd.f32 %v322_v56, %v321_v47  ;;  %v1029_v38 = vadd.f32 %v334_v54, %v333_v51  ;;  %vm436_vm14 = vcmp.eq.f32.partialorder %v435_v10, 8.507059e+37 }
 0x25a   :  { %v397_v1 = vmul.f32 %v713_v58, %v317_v40  ;;  %v389_v4 = vsel %vm388_vm1, %v711_v43, %v385_v26  ;;  %v715_v5 = vpop.eup %714  ;;  %vm402_vm3 = vweird.f32 %v713_v58 }
 0x25b   :  { %716 = vrcp.f32 %v323_v61  ;;  %v394_v8 = vsel %vm391_vm2, %v393_v3, %v389_v4  ;;  %v427_v15 = vmul.f32 %v715_v5, %v1019_v44  ;;  %vm403_vm5 = vmor %vm401_vm4, %vm402_vm3  ;;  %v422_v31 = vand.u32 2147483648, %v323_v61 }
 0x25c   :  { %v398_v62 = vsub.f32 1.0, %v397_v1  ;;  %v459_v11 = vmul.f32 %v988_v52, %v394_v8  ;;  %718 = vrcp.f32 %v1029_v38  ;;  %v420_v33 = vand.u32 2147483647, %v323_v61 }
 0x25d   :  { %v428_v27 = vsub.f32 1.0, %v427_v15  ;;  %vm416_vm8 = vweird.f32 %v323_v61  ;;  %v423_v40 = vor.u32 1.1754944e-38, %v422_v31  ;;  %vm432_vm11 = vweird.f32 %v715_v5 }
 0x25e   :  { %v399_v12 = vmul.f32 %v713_v58, %v398_v62  ;;  %634 = vmatmul.msk.f32.gmra.mxu2 %vm167_vm0, %v459_v11  ;;  %vm421_vm10 = vcmp.eq.f32.partialorder %v420_v33, 8.507059e+37  ;;  %vm433_vm13 = vmor %vm431_vm12, %vm432_vm11  ;;  %v452_v47 = vand.u32 2147483648, %v1029_v38  ;;  %vm446_vm1 = vweird.f32 %v1029_v38 }
 0x25f   :  { %v429_v36 = vmul.f32 %v715_v5, %v428_v27  ;;  %v450_v6 = vand.u32 2147483647, %v1029_v38  ;;  %vm600_vm4 = vcmask 1042434  }
 0x260   :  { %v400_v55 = vadd.f32 %v713_v58, %v399_v12  ;;  %v453_v53 = vor.u32 1.1754944e-38, %v452_v47 }
 0x261   :  { %v717_v20 = vpop.eup %716  ;;  %vm451_vm3 = vcmp.eq.f32.partialorder %v450_v6, 8.507059e+37 }
 0x262   :  { %v404_v21 = vsel %vm403_vm5, %v713_v58, %v400_v55  ;;  %v412_v25 = vmul.f32 %v717_v20, %v323_v61  ;;  %v719_v2 = vpop.eup %718  ;;  %vm417_vm7 = vweird.f32 %v717_v20  ;;  %vm602_vm5 = vcmask 1043459  }
 0x263   :  { %v409_v24 = vsel %vm406_vm6, %v408_v18, %v404_v21  ;;  %v442_v37 = vmul.f32 %v719_v2, %v1029_v38  ;;  %vm418_vm9 = vmor %vm416_vm8, %vm417_vm7  ;;  %vm447_vm15 = vweird.f32 %v719_v2  ;;  %vm604_vm6 = vcmask 1044484  }
 0x264   :  { %v460_v52 = vmul.f32 %v995_v19, %v409_v24  ;;  %v413_v30 = vsub.f32 1.0, %v412_v25  ;;  %v430_v19 = vadd.f32 %v715_v5, %v429_v36  ;;  %vm448_vm2 = vmor %vm446_vm1, %vm447_vm15  ;;  %vm606_vm7 = vcmask 1045509  }
 0x265   :  { %v443_v7 = vsub.f32 1.0, %v442_v37  ;;  %vm608_vm8 = vcmask 1046534  }
 0x266   :  { %v414_v32 = vmul.f32 %v717_v20, %v413_v30  ;;  %635 = vmatmul.msk.f32.gmra.mxu2 %vm167_vm0, %v460_v52  ;;  %v434_v46 = vsel %vm433_vm13, %v715_v5, %v430_v19 }
 0x267   :  { %v444_v48 = vmul.f32 %v719_v2, %v443_v7  ;;  %v439_v50 = vsel %vm436_vm14, %v438_v49, %v434_v46 }
 0x268   :  { %v415_v39 = vadd.f32 %v717_v20, %v414_v32 }
 0x269   :  { %v445_v51 = vadd.f32 %v719_v2, %v444_v48 }
 0x26a   :  { %v419_v41 = vsel %vm418_vm9, %v717_v20, %v415_v39  ;;  %vm610_vm9 = vcmask 1047559  }
 0x26b   :  { %v424_v42 = vsel %vm421_vm10, %v423_v40, %v419_v41  ;;  %v449_v44 = vsel %vm448_vm2, %v719_v2, %v445_v51 }
 0x26c   :  { %v461_v43 = vmul.f32 %v1003_v0, %v424_v42  ;;  %v462_v0 = vmul.f32 %v993_v60, %v439_v50  ;;  %v454_v54 = vsel %vm451_vm3, %v453_v53, %v449_v44 }
 0x26d   :  { %v463_v56 = vmul.f32 %v1001_v63, %v454_v54 }
 0x26e   :  { %636 = vmatmul.msk.f32.gmra.mxu2 %vm167_vm0, %v461_v43 }
 0x276   :  { %637 = vmatmul.msk.f32.gmra.mxu2 %vm167_vm0, %v462_v0 }
 0x27e   :  { %638 = vmatmul.msk.f32.gmra.mxu2 %vm167_vm0, %v463_v56  ;;  %vm598_vm0 = vcmask 1041409  }
 0x2c9   :  { %v510_v57 = vpop.f32.mrf.mxu2 }
 0x2ca   :  { %v534_v1 = vmul.f32 %v510_v57, %v828_v16 }
 0x2cc   :  { %v542_v8 = vrot.slane %v534_v1, 4 }
 0x2d1   :  { %v513_v59 = vpop.f32.mrf.mxu2 }
 0x2d2   :  { %v535_v61 = vmul.f32 %v513_v59, %v852_v22  ;;  %v543_v22 = vadd.f32 %v542_v8, %v534_v1 }
 0x2d4   :  { %v548_v62 = vrot.slane %v535_v61, 4  ;;  %v544_v21 = vrot.slane %v543_v22, 2 }
 0x2d6   :  { %v549_v12 = vadd.f32 %v548_v62, %v535_v61  ;;  %v545_v31 = vadd.f32 %v544_v21, %v543_v22 }
 0x2d8   :  { %v550_v16 = vrot.slane %v549_v12, 2  ;;  %v546_v19 = vrot.slane %v545_v31, 1 }
 0x2d9   :  { %v516_v14 = vpop.f32.mrf.mxu2 }
 0x2da   :  { %v536_v26 = vmul.f32 %v516_v14, %v876_v28  ;;  %v551_v52 = vadd.f32 %v550_v16, %v549_v12  ;;  %v547_v51 = vadd.f32 %v546_v19, %v545_v31 }
 0x2dc   :  { %v554_v5 = vrot.slane %v536_v26, 4  ;;  %v552_v39 = vrot.slane %v551_v52, 1 }
 0x2de   :  { %v555_v55 = vadd.f32 %v554_v5, %v536_v26  ;;  %v553_v10 = vadd.f32 %v552_v39, %v551_v52 }
 0x2e0   :  { %v599_v44 = vsel %vm598_vm0, %v553_v10, %v547_v51 }
 0x2e1   :  { %v519_v58 = vpop.f32.mrf.mxu2 }
 0x2e2   :  { %v537_v38 = vmul.f32 %v519_v58, %v900_v34 }
 0x2e4   :  { %v560_v9 = vrot.slane %v537_v38, 4 }
 0x2e6   :  { %v561_v15 = vadd.f32 %v560_v9, %v537_v38 }
 0x2e8   :  { %v562_v24 = vrot.slane %v561_v15, 2 }
 0x2e9   :  { %v522_v60 = vpop.f32.mrf.mxu2 }
 0x2ea   :  { %v538_v3 = vmul.f32 %v522_v60, %v906_v35  ;;  %v556_v35 = vrot.slane %v555_v55, 2  ;;  %v563_v32 = vadd.f32 %v562_v24, %v561_v15 }
 0x2ec   :  { %v566_v11 = vrot.slane %v538_v3, 4  ;;  %v557_v30 = vadd.f32 %v556_v35, %v555_v55  ;;  %v564_v7 = vrot.slane %v563_v32, 1 }
 0x2ee   :  { %v567_v28 = vadd.f32 %v566_v11, %v538_v3  ;;  %v558_v42 = vrot.slane %v557_v30, 1  ;;  %v565_v47 = vadd.f32 %v564_v7, %v563_v32 }
 0x2f0   :  { %v559_v49 = vadd.f32 %v558_v42, %v557_v30 }
 0x2f1   :  { %v525_v4 = vpop.f32.mrf.mxu2 }
 0x2f2   :  { %v539_v63 = vmul.f32 %v525_v4, %v833_v17  ;;  %v568_v17 = vrot.slane %v567_v28, 2  ;;  %v601_v54 = vsel %vm600_vm4, %v559_v49, %v599_v44 }
 0x2f3   :  { %v603_v57 = vsel %vm602_vm5, %v565_v47, %v601_v54 }
 0x2f4   :  { %v572_v13 = vrot.slane %v539_v63, 4  ;;  %v569_v36 = vadd.f32 %v568_v17, %v567_v28 }
 0x2f6   :  { %v573_v20 = vadd.f32 %v572_v13, %v539_v63  ;;  %v570_v45 = vrot.slane %v569_v36, 1 }
 0x2f8   :  { %v574_v27 = vrot.slane %v573_v20, 2  ;;  %v571_v6 = vadd.f32 %v570_v45, %v569_v36 }
 0x2f9   :  { %v528_v18 = vpop.f32.mrf.mxu2 }
 0x2fa   :  { %v540_v34 = vmul.f32 %v528_v18, %v857_v23  ;;  %v575_v40 = vadd.f32 %v574_v27, %v573_v20  ;;  %v605_v14 = vsel %vm604_vm6, %v571_v6, %v603_v57 }
 0x2fc   :  { %v578_v25 = vrot.slane %v540_v34, 4  ;;  %v576_v46 = vrot.slane %v575_v40, 1 }
 0x2fe   :  { %v579_v2 = vadd.f32 %v578_v25, %v540_v34 }
 0x300   :  { %v580_v33 = vrot.slane %v579_v2, 2 }
 0x301   :  { %v531_v37 = vpop.f32.mrf.mxu2 }
 0x302   :  { %v541_v41 = vmul.f32 %v531_v37, %v881_v29  ;;  %v581_v23 = vadd.f32 %v580_v33, %v579_v2  ;;  %v577_v29 = vadd.f32 %v576_v46, %v575_v40 }
 0x304   :  { %v584_v43 = vrot.slane %v541_v41, 4  ;;  %v582_v50 = vrot.slane %v581_v23, 1  ;;  %v607_v60 = vsel %vm606_vm7, %v577_v29, %v605_v14 }
 0x306   :  { %v585_v48 = vadd.f32 %v584_v43, %v541_v41  ;;  %v583_v56 = vadd.f32 %v582_v50, %v581_v23 }
 0x308   :  { %v586_v0 = vrot.slane %v585_v48, 2  ;;  %v609_v61 = vsel %vm608_vm8, %v583_v56, %v607_v60 }
 0x30a   :  { %v587_v53 = vadd.f32 %v586_v0, %v585_v48 }
 0x30c   :  { %v588_v59 = vrot.slane %v587_v53, 1 }
 0x30e   :  { %v589_v58 = vadd.f32 %v588_v59, %v587_v53 }
 0x310   :  { %v611_v26 = vsel %vm610_vm9, %v589_v58, %v609_v61 }
 0x311   :  { %613 = vst [vmem:[#allocation2] sm:$0xff] %v611_v26 }
 0x312   :  { %624 = dma.vmem_to_hbm [thread:$0]  %s620_s10, 128, %s622_s13, [#allocation3]  }
 0x313   :  { %744 = dma.done.wait [#allocation3], 128  }
 0x314   :  { %745 = vsyncadd [#allocation3], 4294967168 }
 0x315   :  { %629 = vsyncpa [#allocation3], 1 }

</bundles_post_ra>
